<compile_context>
chip_gen: v5e
topology: v5e:2x2
jax: 0.10.0
libtpu: 0.0.40
codegen_flags: <defaults>
</compile_context>

<pallas_src>
import functools

import jax
import jax.numpy as jnp
from jax.experimental import pallas as pl
from jax.experimental.pallas import tpu as pltpu

BN_EPS = 1e-5
NEG_BIG = -1e30  # bias for padded logit lanes -> exp() == 0 in the softmax denominator


def _round_up(n, m):
    return ((n + m - 1) // m) * m


def _device_kind():
    try:
        return jax.devices()[0].device_kind.lower()
    except Exception:
        return ""


def _vmem_capacity_bytes():
    try:
        return int(pltpu.get_tpu_info().vmem_capacity_bytes)
    except Exception:
        kind = _device_kind()
        if "v5" in kind or "v6" in kind:
            return 128 << 20
        return 64 << 20   # v7x (and a conservative default for unknown chips)


def _vmem_limit_bytes():
    # ~85% of physical VMEM; never request more than the chip has (old 100 MiB
    # ceiling is invalid on v7x's 64 MiB).
    return int(0.85 * _vmem_capacity_bytes())


def _lane_granularity():
    # v6e/v7x MXU is 2x256x256 -> prefer >=256-wide tiles; v5e's is 4x128x128.
    kind = _device_kind()
    return 256 if ("v6" in kind or "v7" in kind) else 128


def _pick_tile(h_pad):
    gran = _lane_granularity()
    for t in (512, 256, 128):
        if t >= gran and h_pad % t == 0:
            return t
    return 128  # h_pad is always a multiple of 128


# --------------------------------------------------------------------------- #
# Kernel 1: fc1 (bias cancelled by BN) + BatchNorm1d (training) + ReLU,
#           one tile of hidden features per grid step ("parallel" axis).
# --------------------------------------------------------------------------- #
def fc1_bn_relu_kernel(x_ref, w1_ref, g1_ref, be1_ref, h1_ref, *, inv_b, n_pad):
    xb = x_ref[...].astype(jnp.bfloat16)                 # in-kernel cast (no wrapper pad/cast)
    h = jnp.dot(xb, w1_ref[...], preferred_element_type=jnp.float32)   # (B_pad, TK)

    # Two-pass (centered) batch moments.  Padded batch rows of h are exactly 0
    # (zero input rows, no bias), so only a closed-form correction is needed.
    mean = jnp.sum(h, axis=0, keepdims=True) * inv_b
    c = h - mean
    ss = jnp.sum(c * c, axis=0, keepdims=True)
    if n_pad:
        ss = ss - float(n_pad) * (mean * mean)           # pad rows contributed mean^2 each
    var = jnp.maximum(ss * inv_b, 0.0)                   # biased variance (training BN)
    scale = g1_ref[...] * jax.lax.rsqrt(var + BN_EPS)
    h = jnp.maximum(c * scale + be1_ref[...], 0.0)
    if n_pad:
        row = jax.lax.broadcasted_iota(jnp.int32, h.shape, 0)
        h = jnp.where(row < h.shape[0] - n_pad, h, 0.0)  # keep pad rows exactly 0
    h1_ref[...] = h.astype(jnp.bfloat16)


# --------------------------------------------------------------------------- #
# Kernel 2: fc2 (K-accumulation over hidden tiles, bias cancelled by BN)
#           + BN2 + ReLU + fc3 + softmax(dim=1) at the final grid step.
# --------------------------------------------------------------------------- #
def fc2_bn_fc3_softmax_kernel(h1_ref, w2_ref, g2_ref, be2_ref, w3_ref, b3_ref,
                              o_ref, acc_ref, *, inv_b, n_pad):
    k = pl.program_id(0)

    @pl.when(k == 0)
    def _():
        acc_ref[...] = jnp.zeros_like(acc_ref)

    acc_ref[...] += jnp.dot(h1_ref[...], w2_ref[...],
                            preferred_element_type=jnp.float32)

    @pl.when(k == pl.num_programs(0) - 1)
    def _():
        h = acc_ref[...]                                  # pad batch rows are exactly 0
        mean = jnp.sum(h, axis=0, keepdims=True) * inv_b
        c = h - mean
        ss = jnp.sum(c * c, axis=0, keepdims=True)
        if n_pad:
            ss = ss - float(n_pad) * (mean * mean)
        var = jnp.maximum(ss * inv_b, 0.0)
        scale = g2_ref[...] * jax.lax.rsqrt(var + BN_EPS)
        h2 = jnp.maximum(c * scale + be2_ref[...], 0.0)

        # fc3 in f32 (cheapest matmul, feeds the output directly) + softmax(dim=1).
        # Padded logit lanes carry a -1e30 bias so exp() == 0 -> the (B_pad, o_pad)
        # store and the axis=1 max/sum stay lane-dense / unmasked.
        logits = jnp.dot(h2, w3_ref[...], preferred_element_type=jnp.float32) + b3_ref[...]
        m = jnp.max(logits, axis=1, keepdims=True)
        e = jnp.exp(logits - m)
        denom = jnp.sum(e, axis=1, keepdims=True)
        r = pl.reciprocal(denom, approx=True)             # EUP slot (idle after exp)
        r = r * (2.0 - denom * r)                         # one Newton step, (B_pad, 1) only
        o_ref[...] = e * r


def prepare_params(params):
    """One-time parameter prep: transpose to (in, out), pad hidden/output widths
    to lane multiples, cast MXU operands to bf16 (fc3 weights stay f32)."""
    hidden = params["w1"].shape[0]
    in_dim = params["w1"].shape[1]
    out_dim = params["w3"].shape[0]
    h_pad = _round_up(hidden, 128)
    o_pad = _round_up(out_dim, 128)

    def pad_vec(v, n, value=0.0):
        return jnp.pad(v, (0, n - v.shape[0]),
                       constant_values=value).reshape(1, -1).astype(jnp.float32)

    w1 = jnp.pad(params["w1"].T, ((0, 0), (0, h_pad - hidden))).astype(jnp.bfloat16)
    w2 = jnp.pad(params["w2"].T, ((0, h_pad - hidden), (0, h_pad - hidden))).astype(jnp.bfloat16)
    w3 = jnp.pad(params["w3"].T, ((0, h_pad - hidden), (0, o_pad - out_dim))).astype(jnp.float32)
    b3 = pad_vec(params["b3"], o_pad, value=NEG_BIG)

    # gamma/beta padded with 0 -> padded hidden features stay exactly 0 through
    # BN + ReLU and contribute nothing downstream.
    # NOTE: b1 / b2 are intentionally not forwarded (cancelled by training-mode BN).
    return {
        "w1": w1, "g1": pad_vec(params["g1"], h_pad), "be1": pad_vec(params["be1"], h_pad),
        "w2": w2, "g2": pad_vec(params["g2"], h_pad), "be2": pad_vec(params["be2"], h_pad),
        "w3": w3, "b3": b3,
        "in_dim": in_dim, "out_dim": out_dim, "hidden": hidden,
        "h_pad": h_pad, "o_pad": o_pad,
    }


def encoder_forward(x, prepped, *, tile_k=None):
    """x: (B, input_dim) float32.  prepped: output of prepare_params()."""
    B, in_dim = x.shape
    assert in_dim == prepped["in_dim"]
    h_pad, o_pad, out_dim = prepped["h_pad"], prepped["o_pad"], prepped["out_dim"]

    # Batch padded to a multiple of 16 (bf16 (16,128) sublane tile).  BN stats are
    # corrected for the all-zero pad rows inside the kernels.
    b_pad = _round_up(max(B, 16), 16)
    n_pad = b_pad - B
    xp = x.astype(jnp.float32)
    if n_pad:
        xp = jnp.pad(xp, ((0, n_pad), (0, 0)))
    # x stays f32 and un-padded along features; it is cast to bf16 in-kernel.

    tk = tile_k if tile_k is not None else _pick_tile(h_pad)
    assert h_pad % tk == 0
    n_tiles = h_pad // tk
    inv_b = 1.0 / B
    vmem_limit = _vmem_limit_bytes()

    # ---- call 1: fc1 + BN1 + ReLU, grid over hidden-feature tiles ("parallel") --
    c1_args = (xp, prepped["w1"], prepped["g1"], prepped["be1"])
    c1_bytes = sum(int(a.size) * a.dtype.itemsize for a in c1_args) + b_pad * h_pad * 2
    h1 = pl.pallas_call(
        functools.partial(fc1_bn_relu_kernel, inv_b=inv_b, n_pad=n_pad),
        out_shape=jax.ShapeDtypeStruct((b_pad, h_pad), jnp.bfloat16),
        grid=(n_tiles,),
        in_specs=[
            pl.BlockSpec((b_pad, in_dim), lambda j: (0, 0)),      # x, resident
            pl.BlockSpec((in_dim, tk), lambda j: (0, j)),         # w1 tile, streamed
            pl.BlockSpec((1, tk), lambda j: (0, j)),              # gamma1 tile
            pl.BlockSpec((1, tk), lambda j: (0, j)),              # beta1 tile
        ],
        out_specs=pl.BlockSpec((b_pad, tk), lambda j: (0, j)),
        compiler_params=pltpu.CompilerParams(
            dimension_semantics=("parallel",),                    # v7x: both TensorCores
            vmem_limit_bytes=vmem_limit),
        cost_estimate=pl.CostEstimate(
            flops=2 * b_pad * in_dim * h_pad,
            transcendentals=h_pad,
            bytes_accessed=c1_bytes),
    )(*c1_args)

    # ---- call 2: fc2 (K-accumulation, reduction axis last / "arbitrary")
    #              + BN2 + ReLU + fc3 + softmax at the final step ----------------
    c2_args = (h1, prepped["w2"], prepped["g2"], prepped["be2"],
               prepped["w3"], prepped["b3"])
    c2_bytes = sum(int(a.size) * a.dtype.itemsize for a in c2_args) + b_pad * o_pad * 4
    out_padded = pl.pallas_call(
        functools.partial(fc2_bn_fc3_softmax_kernel, inv_b=inv_b, n_pad=n_pad),
        out_shape=jax.ShapeDtypeStruct((b_pad, o_pad), jnp.float32),
        grid=(n_tiles,),
        in_specs=[
            pl.BlockSpec((b_pad, tk), lambda k: (0, k)),          # h1 tile, streamed
            pl.BlockSpec((tk, h_pad), lambda k: (k, 0)),          # w2 tile, streamed
            pl.BlockSpec((1, h_pad), lambda k: (0, 0)),           # gamma2, resident
            pl.BlockSpec((1, h_pad), lambda k: (0, 0)),           # beta2, resident
            pl.BlockSpec((h_pad, o_pad), lambda k: (0, 0)),       # w3, resident (f32)
            pl.BlockSpec((1, o_pad), lambda k: (0, 0)),           # b3, resident
        ],
        out_specs=pl.BlockSpec((b_pad, o_pad), lambda k: (0, 0)),
        scratch_shapes=[pltpu.VMEM((b_pad, h_pad), jnp.float32)],  # fc2 accumulator
        compiler_params=pltpu.CompilerParams(
            dimension_semantics=("arbitrary",),                   # reduction axis
            vmem_limit_bytes=vmem_limit),
        cost_estimate=pl.CostEstimate(
            flops=2 * b_pad * h_pad * h_pad + 2 * b_pad * h_pad * o_pad,
            transcendentals=b_pad * o_pad + h_pad,
            bytes_accessed=c2_bytes),
    )(*c2_args)
    # TODO(synk): on v7x the fc2 K-accumulation pins call 2 to a single TensorCore;
    # parallelising it needs per-core partial accumulators + a cross-core reduce
    # (core_map + CMEM/semaphores), only worthwhile once hidden_dim makes call 2
    # dominate.

    return out_padded[:B, :out_dim]


def init_params(key, input_dim, hidden_dim, output_dim):
    ks = jax.random.split(key, 6)

    def lin(kw, kb, fan_in, fan_out):
        bound = 1.0 / jnp.sqrt(fan_in)
        w = jax.random.uniform(kw, (fan_out, fan_in), jnp.float32, -bound, bound)
        b = jax.random.uniform(kb, (fan_out,), jnp.float32, -bound, bound)
        return w, b

    w1, b1 = lin(ks[0], ks[1], input_dim, hidden_dim)
    w2, b2 = lin(ks[2], ks[3], hidden_dim, hidden_dim)
    w3, b3 = lin(ks[4], ks[5], hidden_dim, output_dim)
    return {
        "w1": w1, "b1": b1,
        "g1": jnp.ones((hidden_dim,), jnp.float32), "be1": jnp.zeros((hidden_dim,), jnp.float32),
        "w2": w2, "b2": b2,
        "g2": jnp.ones((hidden_dim,), jnp.float32), "be2": jnp.zeros((hidden_dim,), jnp.float32),
        "w3": w3, "b3": b3,
    }


def reference_forward(x, p):
    # Full f32 reference with the original (bias-included, two-pass BN) formulation.
    h = x @ p["w1"].T + p["b1"]
    mu = h.mean(0); var = ((h - mu) ** 2).mean(0)
    h = (h - mu) / jnp.sqrt(var + BN_EPS) * p["g1"] + p["be1"]
    h = jnp.maximum(h, 0.0)
    h = h @ p["w2"].T + p["b2"]
    mu = h.mean(0); var = ((h - mu) ** 2).mean(0)
    h = (h - mu) / jnp.sqrt(var + BN_EPS) * p["g2"] + p["be2"]
    h = jnp.maximum(h, 0.0)
    logits = h @ p["w3"].T + p["b3"]
    return jax.nn.softmax(logits, axis=1)


if __name__ == "__main__":
    # Small test shapes; B=24 exercises the batch-padding/BN-correction path and
    # tile_k=128 gives 2 grid steps (exercises the pl.when init/finalize and the
    # streamed-weight K-accumulation path).
    B, INPUT_DIM, HIDDEN_DIM, OUTPUT_DIM = 24, 64, 256, 32

    key = jax.random.PRNGKey(0)
    kx, kp = jax.random.split(key)
    x = jax.random.normal(kx, (B, INPUT_DIM), jnp.float32)
    params = init_params(kp, INPUT_DIM, HIDDEN_DIM, OUTPUT_DIM)
    prepped = prepare_params(params)

    out = encoder_forward(x, prepped, tile_k=128)
    out = jax.block_until_ready(out)

    ref = reference_forward(x, params)
    assert out.shape == (B, OUTPUT_DIM)
    # bf16 matmul operands for fc1/fc2 -> compare against the f32 reference with a
    # tolerance reflecting bf16 rounding (documented precision trade, fc3 is f32).
    assert jnp.allclose(out, ref, atol=1e-2, rtol=0.0), "mismatch vs reference"
    assert jnp.allclose(out.sum(axis=1), 1.0, atol=1e-4), "softmax rows must sum to 1"

    print("KERNEL_OK")
</pallas_src>

<mosaic_0001>
module attributes {stable_mosaic.version = 11 : i64} {
  func.func @fc1_bn_relu_kernel(%arg0: i32, %arg1: memref<32x64xf32, #tpu.memory_space<vmem>>, %arg2: memref<64x128xbf16, #tpu.memory_space<vmem>>, %arg3: memref<1x128xf32, #tpu.memory_space<vmem>>, %arg4: memref<1x128xf32, #tpu.memory_space<vmem>>, %arg5: memref<32x128xbf16, #tpu.memory_space<vmem>>) attributes {dimension_semantics = [#tpu.dimension_semantics<parallel>], iteration_bounds = array<i64: 2>, scalar_prefetch = 0 : i64, scratch_operands = 0 : i64, tpu.core_type = #tpu.core_type<tc>, window_params = [{pipeline_mode = #tpu.pipeline_mode<synchronous>, transform_indices = @transform_0, window_bounds = array<i64: 32, 64>}, {transform_indices = @transform_1, window_bounds = array<i64: 64, 128>}, {transform_indices = @transform_2, window_bounds = array<i64: 1, 128>}, {transform_indices = @transform_3, window_bounds = array<i64: 1, 128>}, {transform_indices = @transform_4, window_bounds = array<i64: 32, 128>}]} {
    %c0 = arith.constant 0 : index
    %c0_0 = arith.constant 0 : index
    %0 = vector.load %arg1[%c0, %c0_0] : memref<32x64xf32, #tpu.memory_space<vmem>>, vector<32x64xf32>
    %1 = arith.truncf %0 : vector<32x64xf32> to vector<32x64xbf16>
    %c0_1 = arith.constant 0 : index
    %c0_2 = arith.constant 0 : index
    %2 = vector.load %arg2[%c0_1, %c0_2] : memref<64x128xbf16, #tpu.memory_space<vmem>>, vector<64x128xbf16>
    %cst = arith.constant dense<0.000000e+00> : vector<32x128xf32>
    %3 = tpu.matmul %1, %2, %cst {dimension_numbers = #tpu.dot_dimension_numbers<[1], [0], [0], [1], [0, 0, 1, 1], [], []>} : vector<32x64xbf16>, vector<64x128xbf16>, vector<32x128xf32> -> vector<32x128xf32>
    %cst_3 = arith.constant dense<0.000000e+00> : vector<128xf32>
    %4 = vector.multi_reduction <add>, %3, %cst_3 [0] : vector<32x128xf32> to vector<128xf32>
    %5 = vector.shape_cast %4 : vector<128xf32> to vector<1x128xf32>
    %cst_4 = arith.constant 0.0416666679 : f32
    %6 = vector.broadcast %cst_4 : f32 to vector<1x128xf32>
    %7 = arith.mulf %5, %6 : vector<1x128xf32>
    %8 = vector.broadcast %7 : vector<1x128xf32> to vector<32x128xf32>
    %9 = arith.subf %3, %8 : vector<32x128xf32>
    %10 = arith.mulf %9, %9 : vector<32x128xf32>
    %cst_5 = arith.constant dense<0.000000e+00> : vector<128xf32>
    %11 = vector.multi_reduction <add>, %10, %cst_5 [0] : vector<32x128xf32> to vector<128xf32>
    %12 = vector.shape_cast %11 : vector<128xf32> to vector<1x128xf32>
    %13 = arith.mulf %7, %7 : vector<1x128xf32>
    %cst_6 = arith.constant 8.000000e+00 : f32
    %14 = vector.broadcast %cst_6 : f32 to vector<1x128xf32>
    %15 = arith.mulf %14, %13 : vector<1x128xf32>
    %16 = arith.subf %12, %15 : vector<1x128xf32>
    %cst_7 = arith.constant 0.0416666679 : f32
    %17 = vector.broadcast %cst_7 : f32 to vector<1x128xf32>
    %18 = arith.mulf %16, %17 : vector<1x128xf32>
    %cst_8 = arith.constant 0.000000e+00 : f32
    %19 = vector.broadcast %cst_8 : f32 to vector<1x128xf32>
    %20 = arith.maximumf %18, %19 : vector<1x128xf32>
    %c0_9 = arith.constant 0 : index
    %c0_10 = arith.constant 0 : index
    %21 = vector.load %arg3[%c0_9, %c0_10] : memref<1x128xf32, #tpu.memory_space<vmem>>, vector<1x128xf32>
    %cst_11 = arith.constant 9.99999974E-6 : f32
    %22 = vector.broadcast %cst_11 : f32 to vector<1x128xf32>
    %23 = arith.addf %20, %22 : vector<1x128xf32>
    %24 = math.rsqrt %23 : vector<1x128xf32>
    %25 = arith.mulf %21, %24 : vector<1x128xf32>
    %26 = vector.broadcast %25 : vector<1x128xf32> to vector<32x128xf32>
    %27 = arith.mulf %9, %26 : vector<32x128xf32>
    %c0_12 = arith.constant 0 : index
    %c0_13 = arith.constant 0 : index
    %28 = vector.load %arg4[%c0_12, %c0_13] : memref<1x128xf32, #tpu.memory_space<vmem>>, vector<1x128xf32>
    %29 = vector.broadcast %28 : vector<1x128xf32> to vector<32x128xf32>
    %30 = arith.addf %27, %29 : vector<32x128xf32>
    %cst_14 = arith.constant 0.000000e+00 : f32
    %31 = vector.broadcast %cst_14 : f32 to vector<32x128xf32>
    %32 = arith.maximumf %30, %31 : vector<32x128xf32>
    %33 = tpu.iota {dimensions = array<i32: 0>} : vector<32x128xi32>
    %c24_i32 = arith.constant 24 : i32
    %34 = vector.broadcast %c24_i32 : i32 to vector<32x128xi32>
    %35 = arith.cmpi slt, %33, %34 : vector<32x128xi32>
    %cst_15 = arith.constant 0.000000e+00 : f32
    %36 = vector.broadcast %cst_15 : f32 to vector<32x128xf32>
    %37 = arith.select %35, %32, %36 : vector<32x128xi1>, vector<32x128xf32>
    %38 = arith.truncf %37 : vector<32x128xf32> to vector<32x128xbf16>
    %c0_16 = arith.constant 0 : index
    %c0_17 = arith.constant 0 : index
    %39 = vector.load %arg5[%c0_16, %c0_17] : memref<32x128xbf16, #tpu.memory_space<vmem>>, vector<32x128xbf16>
    tpu.vector_store %arg5[%c0_16, %c0_17], %38 {strides = array<i32>} : memref<32x128xbf16, #tpu.memory_space<vmem>>, vector<32x128xbf16>,
    return
  }
  func.func @transform_0(%arg0: i32) -> (i32, i32) {
    %c0_i32 = arith.constant 0 : i32
    %c0_i32_0 = arith.constant 0 : i32
    %c0_i32_1 = arith.constant 0 : i32
    return %c0_i32, %c0_i32_0 : i32, i32
  }
  func.func @transform_1(%arg0: i32) -> (i32, i32) {
    %c0_i32 = arith.constant 0 : i32
    %c0_i32_0 = arith.constant 0 : i32
    return %c0_i32, %arg0 : i32, i32
  }
  func.func @transform_2(%arg0: i32) -> (i32, i32) {
    %c0_i32 = arith.constant 0 : i32
    %c0_i32_0 = arith.constant 0 : i32
    return %c0_i32, %arg0 : i32, i32
  }
  func.func @transform_3(%arg0: i32) -> (i32, i32) {
    %c0_i32 = arith.constant 0 : i32
    %c0_i32_0 = arith.constant 0 : i32
    return %c0_i32, %arg0 : i32, i32
  }
  func.func @transform_4(%arg0: i32) -> (i32, i32) {
    %c0_i32 = arith.constant 0 : i32
    %c0_i32_0 = arith.constant 0 : i32
    return %c0_i32, %arg0 : i32, i32
  }
}

</mosaic_0001>

<bundles_post_ra>
// kernel: tpu_custom_call.1
= control target key start
LH: loop header
LB: loop body
LE: loop exit
PB: predicated region body
PF: predicated region fallthrough
CT: control target
= control target key end

     0   :  { %9 = vsyncpa [#allocation3], 0  ;;  %s1062_s0 = inlined_call_operand.hbm [shape: f32[32,64], index: 0, kind: input, shape index: {}]   ;;  %s1063_s1 = inlined_call_operand.hbm [shape: bf16[64,256], index: 1, kind: input, shape index: {}]   ;;  %s1064_s2 = inlined_call_operand.hbm [shape: f32[1,256], index: 2, kind: input, shape index: {}]   ;;  %s1065_s3 = inlined_call_operand.vmem [shape: f32[1,256], index: 3, kind: input, shape index: {}]   ;;  %s1066_s4 = inlined_call_operand.hbm [shape: bf16[32,256], index: 4, kind: output, shape index: {}]  }
   0x1   :  { %10 = vsyncpa [#allocation6], 0 }
   0x2   :  { %12 = vsyncpa [#allocation6 + $0x1], 0 }
   0x3   :  { %13 = vsyncpa [#allocation4], 0 }
   0x4   :  { %15 = vsyncpa [#allocation4 + $0x1], 0  ;;  %s875_s15 = smov 0   ;;  %s877_s16 = smov 0  }
   0x5   :  { %s879_s17 = smov 0   ;;  %s881_s18 = smov 0  }
   0x6 LB: > { %s896_s19 = sadd.s32 1, %s839_s18   ;;  %s49_s20 = sadd.s32 1, %s835_s17  ;;  %s839_s18 = sphi %s881_s18, %s1076_s18   ;;  %s835_s17 = sphi %s879_s17, %s1075_s17   ;;  %s831_s16 = sphi %s877_s16, %s1074_s16   ;;  %s827_s15 = sphi %s875_s15, %s1073_s15  }
   0x7   : > { %s46_s21 = ssub.s32 %s839_s18, %s896_s19  ;;  %p56_p0 = scmp.ne.s32.totalorder %s835_s17, %s831_s16 }
   0x8   : > { %p47_p1 = scmp.eq.s32.totalorder %s46_s21, 0  ;;  %p57_p2 = scmp.eq.s32.totalorder %s839_s18, 0 }
   0x9   : > { %p632_p5 = scmp.lt.s32.totalorder %s839_s18, 2  ;;  %s178_s23 = sand.u32 1, %s839_s18  }
   0xa   : > { %s906_s22 = scalar_select %p47_p1, %s835_s17, %s49_s20  }
   0xb   : > { %p58_p4 = por %p57_p2, %p56_p0  ;;  %s180_s24 = sand.u32 1, %s835_s17  }
   0xc   : > { %s559_s25 = sshll.u32 %s180_s24, 5  ;;  %s560_s26 = sshll.u32 %s839_s18, 2 }
   0xd   : > { %s186_s29 = scalar_lea.hbm %s1063_s1, %s560_s26  ;;  %s182_s30 = scalar_lea.vmem [#allocation5], %s559_s25 }
   0xe   : > { %s189_s5 = sshll.u32 %s182_s30, 4  ;;  %s187_s6 = sshll.u32 %s186_s29, 4  ;;  %s190_s5 = int_to_ptr.vmem [resolvable:$true] %s189_s5  ;;  %s188_s6 = int_to_ptr.hbm [resolvable:$true] %s187_s6 }
   0xf   : > { %p920_p6 = pnand %p632_p5, %p58_p4  ;;  %s924_s8 = scalar_lea.sflag [#allocation6], %s178_s23 }
  0x10   : > { %s679_s9 = sshra.s32 %s188_s6, 4  ;;  %s686_s13 = scalar_lea.hbm %s1063_s1, 64  ;;  %s680_s9 = int_to_ptr.hbm [resolvable:$true] %s679_s9 }
  0x11   : > { %s681_s10 = scalar_lea.hbm %s680_s9, 32  ;;  %p683_p8 = pneg %p920_p6 }
  0x12   : > { %p682_p7 = scmp.ne.s32.totalorder %s680_s9, %s681_s10  ;;  %p687_p11 = scmp.lt.s32.totalorder %s680_s9, %s1063_s1 }
  0x13   : > { %p688_p12 = scmp.lt.s32.totalorder %s686_s13, %s681_s10 }
  0x14   : > { %p684_p9 = pnand %p683_p8, %p682_p7 }
  0x15   : > { %p689_p13 = por %p688_p12, %p687_p11 }
  0x16   : > { %p685_p10 = pneg %p684_p9 }
  0x18   : > { %p690_p1 = pnand %p689_p13, %p685_p10 }
  0x1a   : > { %693 = shalt.err (!%p690_p1)
}
  0x1b   : > { %s841_s21 = smov 128   ;;  %s842_s23 = smov 64  }
  0x1c   : > { %s843_s25 = smov 4   ;;  %s942_s26 = sadd.s32 4294967295, %s839_s18  }
  0x1d   : > { %623 = dma.hbm_to_vmem [thread:$0]  (!%p920_p6), %s188_s6, 512, %s190_s5, %s924_s8, %s841_s21, %s842_s23, %s843_s25  }
  0x1e   : > { %s555_s27 = sadd.s32 4294967294, %s839_s18   ;;  %p62_p2 = scmp.ne.s32.totalorder %s831_s16, %s827_s15 }
  0x1f   : > { %p63_p4 = scmp.eq.s32.totalorder %s942_s26, 0  ;;  %p138_p5 = scmp.eq.s32.totalorder %s942_s26, 1 }
  0x20   : > { %p144_p7 = scmp.eq.s32.totalorder %s555_s27, 1  ;;  %p556_p9 = scmp.ge.s32.totalorder %s839_s18, 1 }
  0x21   : > { %p952_p10 = por %p63_p4, %p62_p2  ;;  %p959_p11 = por %p138_p5, %p56_p0 }
  0x22   : > { %p963_p12 = por %p144_p7, %p62_p2  ;;  %p151_p13 = scmp.lt.s32.totalorder %s839_s18, 3 }
  0x23   : > { %s162_s9 = sshll.u32 %s1062_s0, 4  ;;  %s844_s11 = smov [#allocation2]   ;;  %s163_s9 = int_to_ptr.hbm [resolvable:$true] %s162_s9 }
  0x24   : > { %p971_p1 = pnand %p556_p9, %p151_p13  ;;  %s164_s12 = sshll.u32 %s844_s11, 4  ;;  %s165_s12 = int_to_ptr.vmem [resolvable:$true] %s164_s12 }
  0x25   : > { %s205_s20 = scalar_lea.hbm %s1064_s2, %s839_s18  ;;  %s202_s25 = scalar_lea.vmem [#allocation7], %s180_s24 }
  0x26   : > { %p616_p0 = pneg %p971_p1  ;;  %s207_s23 = sshll.u32 %s205_s20, 4  ;;  %s208_s23 = int_to_ptr.hbm [resolvable:$true] %s207_s23 }
  0x27   : > { %s209_s27 = sshll.u32 %s202_s25, 4  ;;  %s845_s5 = smov 8   ;;  %s210_s27 = int_to_ptr.vmem [resolvable:$true] %s209_s27 }
  0x28   : > { %p617_p2 = pnand %p616_p0, %p63_p4  ;;  %s739_s6 = sshra.s32 %s208_s23, 4  ;;  %s740_s6 = int_to_ptr.hbm [resolvable:$true] %s739_s6 }
  0x29   : > { %s741_s11 = scalar_lea.hbm %s740_s6, 1  ;;  %s746_s20 = scalar_lea.hbm %s1064_s2, 2 }
  0x2a   : > { %619 = dma.hbm_to_vmem [thread:$0]  (!%p617_p2), %s163_s9, 512, %s165_s12, [#allocation3], %s841_s21, %s841_s21, %s845_s5  }
  0x2b   : > { %p742_p5 = scmp.ne.s32.totalorder %s740_s6, %s741_s11  ;;  %p747_p13 = scmp.lt.s32.totalorder %s740_s6, %s1064_s2 }
  0x2c   : > { %p748_p0 = scmp.lt.s32.totalorder %s746_s20, %s741_s11 }
  0x2d   : > { %p744_p7 = pnand %p742_p5, %p683_p8 }
  0x2e   : > { %p749_p3 = por %p748_p0, %p747_p13 }
  0x2f   : > { %p745_p9 = pneg %p744_p7 }
  0x31   : > { %p750_p2 = pnand %p749_p3, %p745_p9 }
  0x33   : > { %753 = shalt.err (!%p750_p2)
}
  0x34   : > { %626 = dma.hbm_to_vmem [thread:$0]  (!%p920_p6), %s208_s23, 16, %s210_s27, %s924_s8  }
  0x35   : > { %224 = sbr.rel (%p971_p1) target bundleno = 299 (0x12b), region = 36 }
  0x3a   : > { %814 = dma.done.wait (%p63_p4), [#allocation3], 512  }
  0x3b   : > { %816 = vsyncadd (%p63_p4), [#allocation3], 4294966784  ;;  %s231_s21 = sand.u32 1, %s942_s26   ;;  %s1007_s9 = sand.u32 1, %s831_s16  }
  0x3c   : > { %s563_s12 = sshll.u32 %s1007_s9, 5  ;;  %s232_s7 = scalar_lea.sflag [#allocation6], %s231_s21 }
  0x3d   : > { %s235_s5 = scalar_lea.vmem [#allocation5], %s563_s12 }
  0x3e   : > { %818 = dma.done.wait (%p952_p10), %s232_s7, 528  }
  0x3f   : > { %820 = vsyncadd (%p952_p10), %s232_s7, 4294966768  ;;  %v590_v0 = vld [vmem:[%s235_s5 + $0x18] sm:$0xff]  ;;  %v589_v1 = vld [vmem:[%s235_s5 + $0x10] sm:$0xff]  ;;  %vm319_vm0 = vcmask 523264   ;;  %p277_p3 = scmp.lt.s32.totalorder %s942_s26, 1  ;;  %s244_s27 = scalar_lea.vmem [#allocation7], %s1007_s9 }
  0x40   : > { %330 = vmatpush.bf16.msra.mxu0 %v590_v0  ;;  %602 = vmatpush.bf16.msra.mxu1 %v590_v0  ;;  %v588_v2 = vld [vmem:[%s235_s5 + $0x8] sm:$0xff]  ;;  %v587_v3 = vld [vmem:[%s235_s5] sm:$0xff]  ;;  %v283_v6 = vld [vmem:[#allocation2 + $0x10] sm:$0xff]  ;;  %s564_s6 = sshll.u32 %s1007_s9, 4  ;;  %s584_s11 = sshll.u32 %s942_s26, 2  ;;  %v846_v0 = vmov 0.0|0.0  }
  0x41   : > { %v281_v4 = vld [vmem:[#allocation2] sm:$0xff]  ;;  %v282_v5 = vld [vmem:[#allocation2 + $0x8] sm:$0xff]  ;;  %v284_v7 = vld [vmem:[#allocation2 + $0x18] sm:$0xff]  ;;  %s1016_s8 = scalar_select %p277_p3, %s942_s26, 1 }
  0x42   : > { %v285_v8 = vpack.c.bf16 %v282_v5, %v281_v4  ;;  %v286_v9 = vpack.c.bf16 %v284_v7, %v283_v6  ;;  %v377_v52 = vld [vmem:[%s244_s27] sm:$0x1]  ;;  %s441_s25 = scalar_lea.hbm %s1066_s4, %s584_s11  ;;  %s276_s26 = scalar_lea.vmem [#allocation8], %s564_s6 }
  0x43   : > { %s279_s23 = scalar_lea.vmem %s1065_s3, %s1016_s8  ;;  %s442_s21 = sshll.u32 %s276_s26, 4  ;;  %s443_s21 = int_to_ptr.vmem [resolvable:$true] %s442_s21 }
  0x44   : > { %331 = vmatpush.bf16.msra.mxu0 %v589_v1  ;;  %603 = vmatpush.bf16.msra.mxu1 %v589_v1  ;;  %v676_v57 = vld [vmem:[%s279_s23] ss:$0 sm:$0xff]  ;;  %v598_v1 = vunpack.c.l.bf16 %v846_v0  ;;  %s444_s12 = sshll.u32 %s441_s25, 4  ;;  %s431_s7 = scalar_lea.sflag [#allocation4], %s1007_s9  ;;  %s445_s12 = int_to_ptr.hbm [resolvable:$true] %s444_s12 }
  0x45   : > { %s783_s5 = sshra.s32 %s445_s12, 4  ;;  %s789_s23 = scalar_lea.hbm %s1066_s4, 32  ;;  %s784_s5 = int_to_ptr.hbm [resolvable:$true] %s783_s5 }
  0x46   : > { %s785_s8 = scalar_lea.hbm %s784_s5, 16  ;;  %p790_p10 = scmp.lt.s32.totalorder %s784_s5, %s1066_s4 }
  0x47   : > { %p786_p6 = scmp.ne.s32.totalorder %s784_s5, %s785_s8  ;;  %p791_p1 = scmp.lt.s32.totalorder %s789_s23, %s785_s8 }
  0x48   : > { %332 = vmatpush.bf16.msra.mxu0 %v588_v2  ;;  %604 = vmatpush.bf16.msra.mxu1 %v588_v2 }
  0x49   : > { %p787_p8 = pnand %p786_p6, %p959_p11  ;;  %p792_p5 = por %p791_p1, %p790_p10 }
  0x4b   : > { %p788_p4 = pneg %p787_p8 }
  0x4c   : > { %333 = vmatpush.bf16.msra.mxu0 %v587_v3  ;;  %605 = vmatpush.bf16.msra.mxu1 %v587_v3 }
  0x4d   : > { %p793_p7 = pnand %p792_p5, %p788_p4 }
  0x4f   : > { %581 = vmatmul.msk.bf16.vlgmr.msra.gmra.mxu0 %vm319_vm0, %v285_v8  ;;  %582 = vmatmul.msk.bf16.vlgmr.msra.gmra.mxu1 %vm319_vm0, %v286_v9 }
  0xcc   : > { %v335_v10 = vpop.f32.mrf.mxu0  ;;  %v340_v11 = vpop.f32.mrf.mxu1 }
  0xd4   : > { %v337_v12 = vpop.f32.mrf.mxu0  ;;  %v342_v15 = vpop.f32.mrf.mxu1 }
  0xd5   : > { %v345_v13 = vadd.f32 %v337_v12, %v335_v10 }
  0xd7   : > { %v346_v14 = vadd.f32 %v345_v13, %v340_v11 }
  0xd9   : > { %v347_v16 = vadd.f32 %v346_v14, %v342_v15 }
  0xdb   : > { %v348_v17 = vrot.slane %v347_v16, 4 }
  0xdd   : > { %v349_v18 = vadd.f32 %v348_v17, %v347_v16 }
  0xdf   : > { %v350_v19 = vrot.slane %v349_v18, 2 }
  0xe1   : > { %v351_v20 = vadd.f32 %v350_v19, %v349_v18 }
  0xe3   : > { %v352_v21 = vrot.slane %v351_v20, 1 }
  0xe5   : > { %v353_v22 = vadd.f32 %v352_v21, %v351_v20 }
  0xe7   : > { %v354_v23 = vmul.f32 0.041666668, %v353_v22 }
  0xe9   : > { %v355_v24 = vsub.f32 %v335_v10, %v354_v23  ;;  %v356_v25 = vsub.f32 %v337_v12, %v354_v23  ;;  %v357_v26 = vsub.f32 %v340_v11, %v354_v23  ;;  %v358_v27 = vsub.f32 %v342_v15, %v354_v23 }
  0xea   : > { %v372_v39 = vmul.f32 %v354_v23, %v354_v23 }
  0xeb   : > { %v359_v28 = vmul.f32 %v355_v24, %v355_v24  ;;  %v360_v29 = vmul.f32 %v356_v25, %v356_v25  ;;  %v361_v30 = vmul.f32 %v357_v26, %v357_v26  ;;  %v362_v32 = vmul.f32 %v358_v27, %v358_v27 }
  0xec   : > { %v373_v42 = vmul.f32 8.0, %v372_v39 }
  0xed   : > { %v363_v31 = vadd.f32 %v360_v29, %v359_v28 }
  0xef   : > { %v364_v33 = vadd.f32 %v363_v31, %v361_v30 }
  0xf1   : > { %v365_v34 = vadd.f32 %v364_v33, %v362_v32 }
  0xf3   : > { %v366_v35 = vrot.slane %v365_v34, 4 }
  0xf5   : > { %v367_v36 = vadd.f32 %v366_v35, %v365_v34 }
  0xf7   : > { %v368_v37 = vrot.slane %v367_v36, 2 }
  0xf9   : > { %v369_v38 = vadd.f32 %v368_v37, %v367_v36 }
  0xfb   : > { %v370_v40 = vrot.slane %v369_v38, 1 }
  0xfd   : > { %v371_v41 = vadd.f32 %v370_v40, %v369_v38 }
  0xff   : > { %v374_v43 = vsub.f32 %v371_v41, %v373_v42 }
 0x101   : > { %v375_v44 = vmul.f32 0.041666668, %v374_v43 }
 0x103   : > { %v376_v45 = vmax.f32 %v375_v44, 0.0 }
 0x105   : > { %v378_v46 = vadd.f32 1e-05, %v376_v45 }
 0x107   : > { %677 = vrsqrt.f32 %v378_v46  ;;  %vm385_vm2 = vweird.f32 %v378_v46 }
 0x10d   : > { %v678_v47 = vpop.eup %677 }
 0x10e   : > { %v380_v48 = vmul.f32 %v678_v47, %v378_v46  ;;  %vm386_vm1 = vweird.f32 %v678_v47 }
 0x10f   : > { %vm387_vm3 = vmor %vm385_vm2, %vm386_vm1 }
 0x110   : > { %v381_v49 = vmul.f32 %v678_v47, %v380_v48 }
 0x112   : > { %v382_v50 = vmul.f32 0.5, %v381_v49 }
 0x114   : > { %v383_v51 = vsub.f32 1.5, %v382_v50 }
 0x116   : > { %v384_v53 = vmul.f32 %v678_v47, %v383_v51 }
 0x118   : > { %v388_v54 = vsel %vm387_vm3, %v678_v47, %v384_v53 }
 0x119   : > { %v389_v55 = vmul.f32 %v388_v54, %v377_v52 }
 0x11b   : > { %v391_v56 = vperm.slane %v389_v55, 0 }
 0x11d   : > { %v393_v58 = vmul.f32 %v391_v56, %v355_v24  ;;  %v394_v59 = vmul.f32 %v391_v56, %v356_v25  ;;  %v395_v60 = vmul.f32 %v391_v56, %v357_v26 }
 0x11f   : > { %v401_v61 = vadd.f32 %v676_v57, %v393_v58  ;;  %v402_v62 = vadd.f32 %v676_v57, %v394_v59  ;;  %v403_v63 = vadd.f32 %v676_v57, %v395_v60 }
 0x121   : > { %v405_v2 = vmax.f32 %v401_v61, 0.0  ;;  %v406_v3 = vmax.f32 %v402_v62, 0.0  ;;  %v407_v4 = vmax.f32 %v403_v63, 0.0 }
 0x123   : > { %v594_v5 = vpack.c.bf16 %v406_v3, %v405_v2  ;;  %v599_v6 = vpack.c.bf16 %v598_v1, %v407_v4 }
 0x125   : > { %595 = vst [vmem:[%s276_s26] sm:$0xff] %v594_v5  }
 0x126   : > { %601 = vst [vmem:[%s276_s26 + $0x8] sm:$0xff] %v599_v6  }
 0x127   : > { %796 = shalt.err (!%p793_p7)
}
 0x128   : > { %s847_s9 = smov 64   ;;  %s848_s11 = smov 128  }
 0x129   : > { %s849_s13 = smov 4  }
 0x12a   : > { %614 = dma.vmem_to_hbm [thread:$0]  (%p959_p11), %s443_s21, 256, %s445_s12, %s431_s7, %s847_s9, %s848_s11, %s849_s13  }
 0x12b PF: > { %s459_s14 = sand.u32 1, %s827_s15   ;;  %p1072_p9 = scmp.ge.s32.totalorder %s839_s18, 2 }
 0x12c   : > { %s460_s20 = scalar_lea.sflag [#allocation4], %s459_s14 }
 0x12d   : > { %p628_p13 = pnand %p1072_p9, %p963_p12 }
 0x12f   : > { %p629_p0 = pneg %p628_p13 }
 0x131   : > { %822 = dma.done.wait (%p629_p0), %s460_s20, 256  }
 0x132   : > { %824 = vsyncadd (%p629_p0), %s460_s20, 4294967040  ;;  %p18_p2 = scmp.ge.s32.totalorder %s896_s19, 4   ;;  %s1073_s15 = smov %s831_s16 }
 0x133   : > { %s1074_s16 = smov %s835_s17  ;;  %s1075_s17 = smov %s906_s22 }
 0x134   : > { %s1076_s18 = smov %s896_s19  ;;  %20 = sbr.rel (!%p18_p2) target bundleno = 6 (0x6), region = 100 }
 0x139   :  { %466 = vsyncpa [#allocation3], 1 }
 0x13a   :  { %468 = vsyncpa [#allocation3 + $0x1], 1 }
 0x13b   :  { %469 = vsyncpa [#allocation6], 1 }
 0x13c   :  { %471 = vsyncpa [#allocation6 + $0x1], 1 }
 0x13d   :  { %472 = vsyncpa [#allocation4], 1 }
 0x13e   :  { %474 = vsyncpa [#allocation4 + $0x1], 1 }

</bundles_post_ra>
